<compile_context>
chip_gen: v7x
topology: tpu7x:2x2x1
jax: 0.10.0
libtpu: 0.0.40
codegen_flags: <defaults>
</compile_context>

<pallas_src>
import jax
import jax.numpy as jnp
from jax.experimental import pallas as pl
from jax.experimental.pallas import tpu as pltpu


def compose_mlp_kernel(hl_ref, hr_ref, w1a_ref, w1b_ref, b1_ref,
                       w2_ref, b2_ref, o_ref):
    # Layer 0: [hl | hr] @ W1 == hl @ W1a + hr @ W1b  (two MXU dots, f32 acc).
    h = jnp.dot(hl_ref[...], w1a_ref[...], preferred_element_type=jnp.float32)
    h = h + jnp.dot(hr_ref[...], w1b_ref[...], preferred_element_type=jnp.float32)
    h = jnp.maximum(h + b1_ref[...], 0.0)                      # bias + ReLU (f32)

    # Layer 1: (S -> S) + ReLU.
    h = jnp.dot(h.astype(w2_ref.dtype), w2_ref[...],
                preferred_element_type=jnp.float32)
    h = jnp.maximum(h + b2_ref[...], 0.0)

    o_ref[...] = h.astype(o_ref.dtype)


def _default_tile_b(B):
    """Multiple-of-8 batch tile, <= 512, giving >= 2 grid steps when possible."""
    B8 = ((B + 7) // 8) * 8
    if B8 <= 8:
        return 8
    tile = min(512, ((B8 // 2 + 7) // 8) * 8)   # ~half the batch, rounded to 8
    return max(8, tile)


def compose_mlp(h_left, h_right, w1_t, b1, w2_t, b2, *, tile_b=None):
    """h_left, h_right: [B, S].  w1_t: [2S, S], w2_t: [S, S], biases: [S] or [1, S]."""
    B, S = h_left.shape
    assert h_right.shape == (B, S)
    assert w1_t.shape == (2 * S, S) and w2_t.shape == (S, S)
    b1 = b1.reshape(1, -1)
    b2 = b2.reshape(1, -1)

    if tile_b is None:
        tile_b = _default_tile_b(B)
    assert tile_b % 8 == 0

    # Lane-dense padding of the feature axis (ReLU(0)=0 => padding is exact).
    S_pad = ((S + 127) // 128) * 128
    pad_f = S_pad - S
    B_pad = ((B + tile_b - 1) // tile_b) * tile_b
    pad_b = B_pad - B

    hl = jnp.pad(h_left, ((0, pad_b), (0, pad_f)))
    hr = jnp.pad(h_right, ((0, pad_b), (0, pad_f)))
    # Split W1 at the original concat boundary, pad each half independently.
    w1a = jnp.pad(w1_t[:S], ((0, pad_f), (0, pad_f)))           # [S_pad, S_pad]
    w1b = jnp.pad(w1_t[S:], ((0, pad_f), (0, pad_f)))           # [S_pad, S_pad]
    w2_p = jnp.pad(w2_t, ((0, pad_f), (0, pad_f)))              # [S_pad, S_pad]
    b1_p = jnp.pad(b1, ((0, 0), (0, pad_f)))                    # [1, S_pad]
    b2_p = jnp.pad(b2, ((0, 0), (0, pad_f)))                    # [1, S_pad]

    # VMEM budget: double-buffered activations + resident weights + f32 temps.
    itm = jnp.dtype(h_left.dtype).itemsize
    est = (2 * 3 * tile_b * S_pad * itm                         # hl, hr, out x2 bufs
           + 2 * (3 * S_pad * S_pad + 2 * S_pad) * itm          # W1a, W1b, W2, biases
           + 4 * tile_b * S_pad * 4)                            # f32 intermediates
    vmem_limit = int(min(max(2 * est, 16 * 2 ** 20), 48 * 2 ** 20))

    grid = (B_pad // tile_b,)

    out = pl.pallas_call(
        compose_mlp_kernel,
        out_shape=jax.ShapeDtypeStruct((B_pad, S_pad), h_left.dtype),
        grid_spec=pltpu.PrefetchScalarGridSpec(
            num_scalar_prefetch=0,
            grid=grid,
            in_specs=[
                pl.BlockSpec((tile_b, S_pad), lambda i: (i, 0)),     # h_left tile
                pl.BlockSpec((tile_b, S_pad), lambda i: (i, 0)),     # h_right tile
                # Constant index maps: weights/biases DMA'd once, stay resident.
                pl.BlockSpec((S_pad, S_pad), lambda i: (0, 0)),      # W1a^T
                pl.BlockSpec((S_pad, S_pad), lambda i: (0, 0)),      # W1b^T
                pl.BlockSpec((1, S_pad), lambda i: (0, 0)),          # b1
                pl.BlockSpec((S_pad, S_pad), lambda i: (0, 0)),      # W2^T
                pl.BlockSpec((1, S_pad), lambda i: (0, 0)),          # b2
            ],
            out_specs=pl.BlockSpec((tile_b, S_pad), lambda i: (i, 0)),
        ),
        compiler_params=pltpu.CompilerParams(
            dimension_semantics=("parallel",),     # batch tiles shard across v7x TCs
            vmem_limit_bytes=vmem_limit,
        ),
    )(hl, hr, w1a, w1b, b1_p, w2_p, b2_p)

    return out[:B, :S]


def compose_mlp_ref(h_left, h_right, w1_t, b1, w2_t, b2):
    h = jnp.concatenate([h_left, h_right], axis=1)
    h = jnp.maximum(h @ w1_t + b1.reshape(1, -1), 0.0)
    h = jnp.maximum(h @ w2_t + b2.reshape(1, -1), 0.0)
    return h


if __name__ == "__main__":
    key = jax.random.PRNGKey(0)
    B, S = 16, 32                      # batch=16, hidden size=32, n_layers=2

    k_hl, k_hr, k_w1, k_b1, k_w2, k_b2 = jax.random.split(key, 6)

    # Inputs: the two children being composed (hs = [h_left, h_right]).
    h_left = jax.random.normal(k_hl, (B, S), dtype=jnp.float32)
    h_right = jax.random.normal(k_hr, (B, S), dtype=jnp.float32)

    # Parameters matching nn.Linear shapes (PyTorch default uniform init):
    #   layer0.weight: [S, 2S], layer0.bias: [S]
    #   layer1.weight: [S, S],  layer1.bias: [S]
    bound0 = 1.0 / jnp.sqrt(2.0 * S)
    bound1 = 1.0 / jnp.sqrt(1.0 * S)
    w1 = jax.random.uniform(k_w1, (S, 2 * S), jnp.float32, -bound0, bound0)
    b1 = jax.random.uniform(k_b1, (S,), jnp.float32, -bound0, bound0)
    w2 = jax.random.uniform(k_w2, (S, S), jnp.float32, -bound1, bound1)
    b2 = jax.random.uniform(k_b2, (S,), jnp.float32, -bound1, bound1)

    # Pre-transpose weights to [in, out] for the x @ W hot path.
    w1_t = w1.T                          # [2S, S]
    w2_t = w2.T                          # [S, S]

    # TODO(synk): for production sizes on v6e/v7x, cast activations/weights to
    # bf16 at this boundary (keep f32 accumulate/bias/ReLU) for ~2x MXU + BW.
    out = compose_mlp(h_left, h_right, w1_t, b1, w2_t, b2)
    out = jax.block_until_ready(out)

    ref = compose_mlp_ref(h_left, h_right, w1_t, b1, w2_t, b2)
    assert out.shape == (B, S)
    assert jnp.allclose(out, ref, atol=1e-5, rtol=1e-5)

    print("KERNEL_OK")
</pallas_src>

<mosaic_0001>
module attributes {stable_mosaic.version = 11 : i64} {
  func.func @compose_mlp_kernel(%arg0: i32, %arg1: memref<8x128xf32, #tpu.memory_space<vmem>>, %arg2: memref<8x128xf32, #tpu.memory_space<vmem>>, %arg3: memref<128x128xf32, #tpu.memory_space<vmem>>, %arg4: memref<128x128xf32, #tpu.memory_space<vmem>>, %arg5: memref<1x128xf32, #tpu.memory_space<vmem>>, %arg6: memref<128x128xf32, #tpu.memory_space<vmem>>, %arg7: memref<1x128xf32, #tpu.memory_space<vmem>>, %arg8: memref<8x128xf32, #tpu.memory_space<vmem>>) attributes {dimension_semantics = [#tpu.dimension_semantics<parallel>], iteration_bounds = array<i64: 2>, scalar_prefetch = 0 : i64, scratch_operands = 0 : i64, tpu.core_type = #tpu.core_type<tc>, window_params = [{transform_indices = @transform_0, window_bounds = array<i64: 8, 128>}, {transform_indices = @transform_1, window_bounds = array<i64: 8, 128>}, {pipeline_mode = #tpu.pipeline_mode<synchronous>, transform_indices = @transform_2, window_bounds = array<i64: 128, 128>}, {pipeline_mode = #tpu.pipeline_mode<synchronous>, transform_indices = @transform_3, window_bounds = array<i64: 128, 128>}, {pipeline_mode = #tpu.pipeline_mode<synchronous>, transform_indices = @transform_4, window_bounds = array<i64: 1, 128>}, {pipeline_mode = #tpu.pipeline_mode<synchronous>, transform_indices = @transform_5, window_bounds = array<i64: 128, 128>}, {pipeline_mode = #tpu.pipeline_mode<synchronous>, transform_indices = @transform_6, window_bounds = array<i64: 1, 128>}, {transform_indices = @transform_7, window_bounds = array<i64: 8, 128>}]} {
    %c0 = arith.constant 0 : index
    %c0_0 = arith.constant 0 : index
    %0 = vector.load %arg1[%c0, %c0_0] : memref<8x128xf32, #tpu.memory_space<vmem>>, vector<8x128xf32>
    %c0_1 = arith.constant 0 : index
    %c0_2 = arith.constant 0 : index
    %1 = vector.load %arg3[%c0_1, %c0_2] : memref<128x128xf32, #tpu.memory_space<vmem>>, vector<128x128xf32>
    %cst = arith.constant dense<0.000000e+00> : vector<8x128xf32>
    %2 = tpu.matmul %0, %1, %cst {dimension_numbers = #tpu.dot_dimension_numbers<[1], [0], [0], [1], [0, 0, 1, 1], [], []>} : vector<8x128xf32>, vector<128x128xf32>, vector<8x128xf32> -> vector<8x128xf32>
    %c0_3 = arith.constant 0 : index
    %c0_4 = arith.constant 0 : index
    %3 = vector.load %arg2[%c0_3, %c0_4] : memref<8x128xf32, #tpu.memory_space<vmem>>, vector<8x128xf32>
    %c0_5 = arith.constant 0 : index
    %c0_6 = arith.constant 0 : index
    %4 = vector.load %arg4[%c0_5, %c0_6] : memref<128x128xf32, #tpu.memory_space<vmem>>, vector<128x128xf32>
    %cst_7 = arith.constant dense<0.000000e+00> : vector<8x128xf32>
    %5 = tpu.matmul %3, %4, %cst_7 {dimension_numbers = #tpu.dot_dimension_numbers<[1], [0], [0], [1], [0, 0, 1, 1], [], []>} : vector<8x128xf32>, vector<128x128xf32>, vector<8x128xf32> -> vector<8x128xf32>
    %6 = arith.addf %2, %5 : vector<8x128xf32>
    %c0_8 = arith.constant 0 : index
    %c0_9 = arith.constant 0 : index
    %7 = vector.load %arg5[%c0_8, %c0_9] : memref<1x128xf32, #tpu.memory_space<vmem>>, vector<1x128xf32>
    %8 = vector.broadcast %7 : vector<1x128xf32> to vector<8x128xf32>
    %9 = arith.addf %6, %8 : vector<8x128xf32>
    %cst_10 = arith.constant 0.000000e+00 : f32
    %10 = vector.broadcast %cst_10 : f32 to vector<8x128xf32>
    %11 = arith.maximumf %9, %10 : vector<8x128xf32>
    %c0_11 = arith.constant 0 : index
    %c0_12 = arith.constant 0 : index
    %12 = vector.load %arg6[%c0_11, %c0_12] : memref<128x128xf32, #tpu.memory_space<vmem>>, vector<128x128xf32>
    %cst_13 = arith.constant dense<0.000000e+00> : vector<8x128xf32>
    %13 = tpu.matmul %11, %12, %cst_13 {dimension_numbers = #tpu.dot_dimension_numbers<[1], [0], [0], [1], [0, 0, 1, 1], [], []>} : vector<8x128xf32>, vector<128x128xf32>, vector<8x128xf32> -> vector<8x128xf32>
    %c0_14 = arith.constant 0 : index
    %c0_15 = arith.constant 0 : index
    %14 = vector.load %arg7[%c0_14, %c0_15] : memref<1x128xf32, #tpu.memory_space<vmem>>, vector<1x128xf32>
    %15 = vector.broadcast %14 : vector<1x128xf32> to vector<8x128xf32>
    %16 = arith.addf %13, %15 : vector<8x128xf32>
    %cst_16 = arith.constant 0.000000e+00 : f32
    %17 = vector.broadcast %cst_16 : f32 to vector<8x128xf32>
    %18 = arith.maximumf %16, %17 : vector<8x128xf32>
    %c0_17 = arith.constant 0 : index
    %c0_18 = arith.constant 0 : index
    %19 = vector.load %arg8[%c0_17, %c0_18] : memref<8x128xf32, #tpu.memory_space<vmem>>, vector<8x128xf32>
    tpu.vector_store %arg8[%c0_17, %c0_18], %18 {strides = array<i32>} : memref<8x128xf32, #tpu.memory_space<vmem>>, vector<8x128xf32>,
    return
  }
  func.func @transform_0(%arg0: i32) -> (i32, i32) {
    %c0_i32 = arith.constant 0 : i32
    %c0_i32_0 = arith.constant 0 : i32
    return %arg0, %c0_i32 : i32, i32
  }
  func.func @transform_1(%arg0: i32) -> (i32, i32) {
    %c0_i32 = arith.constant 0 : i32
    %c0_i32_0 = arith.constant 0 : i32
    return %arg0, %c0_i32 : i32, i32
  }
  func.func @transform_2(%arg0: i32) -> (i32, i32) {
    %c0_i32 = arith.constant 0 : i32
    %c0_i32_0 = arith.constant 0 : i32
    %c0_i32_1 = arith.constant 0 : i32
    return %c0_i32, %c0_i32_0 : i32, i32
  }
  func.func @transform_3(%arg0: i32) -> (i32, i32) {
    %c0_i32 = arith.constant 0 : i32
    %c0_i32_0 = arith.constant 0 : i32
    %c0_i32_1 = arith.constant 0 : i32
    return %c0_i32, %c0_i32_0 : i32, i32
  }
  func.func @transform_4(%arg0: i32) -> (i32, i32) {
    %c0_i32 = arith.constant 0 : i32
    %c0_i32_0 = arith.constant 0 : i32
    %c0_i32_1 = arith.constant 0 : i32
    return %c0_i32, %c0_i32_0 : i32, i32
  }
  func.func @transform_5(%arg0: i32) -> (i32, i32) {
    %c0_i32 = arith.constant 0 : i32
    %c0_i32_0 = arith.constant 0 : i32
    %c0_i32_1 = arith.constant 0 : i32
    return %c0_i32, %c0_i32_0 : i32, i32
  }
  func.func @transform_6(%arg0: i32) -> (i32, i32) {
    %c0_i32 = arith.constant 0 : i32
    %c0_i32_0 = arith.constant 0 : i32
    %c0_i32_1 = arith.constant 0 : i32
    return %c0_i32, %c0_i32_0 : i32, i32
  }
  func.func @transform_7(%arg0: i32) -> (i32, i32) {
    %c0_i32 = arith.constant 0 : i32
    %c0_i32_0 = arith.constant 0 : i32
    return %arg0, %c0_i32 : i32, i32
  }
}

</mosaic_0001>

<bundles_post_ra>
// kernel: tpu_custom_call.1
= control target key start
LH: loop header
LB: loop body
LE: loop exit
PB: predicated region body
PF: predicated region fallthrough
CT: control target
= control target key end

     0   :  { %s1742_s0 = inlined_call_operand.hbm [shape: f32[16,128], index: 0, kind: input, shape index: {}]   ;;  %s1743_s1 = inlined_call_operand.hbm [shape: f32[16,128], index: 1, kind: input, shape index: {}]   ;;  %s1744_s2 = inlined_call_operand.hbm [shape: f32[128,128], index: 2, kind: input, shape index: {}]   ;;  %s1745_s3 = inlined_call_operand.hbm [shape: f32[128,128], index: 3, kind: input, shape index: {}]   ;;  %s1746_s4 = inlined_call_operand.vmem [shape: f32[1,128], index: 4, kind: input, shape index: {}]   ;;  %s1747_s5 = inlined_call_operand.hbm [shape: f32[128,128], index: 5, kind: input, shape index: {}]   ;;  %s1748_s6 = inlined_call_operand.vmem [shape: f32[1,128], index: 6, kind: input, shape index: {}]   ;;  %s1749_s7 = inlined_call_operand.hbm [shape: f32[16,128], index: 7, kind: output, shape index: {}]  }
   0x1   :  { %1755 = sst [smem:[#allocation18_spill]] %s1744_s2 }
   0x2   :  { %1756 = sst [smem:[#allocation19_spill]] %s1745_s3 }
   0x3   :  { %1757 = sst [smem:[#allocation20_spill]] %s1747_s5 }
   0x4   :  { %12 = vsyncpa [#allocation3], 0 }
   0x5   :  { %14 = vsyncpa [#allocation3 + $0x1], 0 }
   0x6   :  { %15 = vsyncpa [#allocation6], 0 }
   0x7   :  { %17 = vsyncpa [#allocation6 + $0x1], 0 }
   0x8   :  { %18 = vsyncpa [#allocation9], 0 }
   0x9   :  { %19 = vsyncpa [#allocation4], 0 }
   0xa   :  { %21 = vsyncpa [#allocation4 + $0x1], 0  ;;  %s1400_s24 = smov 0   ;;  %s1402_s25 = smov 0  }
   0xb   :  { %s1404_s26 = smov 0   ;;  %s1406_s27 = smov 0  }
   0xc LB: > { %s1421_s28 = sadd.s32 4294967295, %s1347_s27   ;;  %s787_s29 = sadd.s32 4294967294, %s1347_s27   ;;  %s1347_s27 = sphi %s1406_s27, %s1783_s27   ;;  %s1343_s26 = sphi %s1404_s26, %s1782_s26   ;;  %s1339_s25 = sphi %s1402_s25, %s1781_s25   ;;  %s1335_s24 = sphi %s1400_s24, %s1780_s24  }
   0xd   : > { %p47_p0 = scmp.ne.s32.totalorder %s1339_s25, %s1335_s24  ;;  %p1750_p1 = scmp.eq.s32.totalorder %s1421_s28, 0 }
   0xe   : > { %p208_p3 = scmp.eq.s32.totalorder %s787_s29, 1  ;;  %p788_p5 = scmp.ge.s32.totalorder %s1347_s27, 1 }
   0xf   : > { %p1430_p4 = por %p1750_p1, %p47_p0  ;;  %p215_p7 = scmp.lt.s32.totalorder %s1347_s27, 3 }
  0x10   : > { %p1435_p6 = por %p208_p3, %p47_p0  ;;  %s1349_s10 = smov [#allocation7]  }
  0x11   : > { %s1758_s30 = scalar_select %p1430_p4, 1, 0 }
  0x12   : > { %s1759_s8 = scalar_select %p1435_p6, 1, 0 }
  0x13   : > { %p1440_p8 = pnand %p788_p5, %p215_p7  ;;  %s227_s11 = sshll.u32 %s1349_s10, 4  ;;  %s1444_s11 = int_to_ptr.vmem [resolvable:$true] %s227_s11 }
  0x14   : > { %1760 = sst [smem:[#allocation17_spill]] %s1759_s8  ;;  %s1350_s13 = smov [#allocation8]  }
  0x15   : > { %s1761_s9 = scalar_select %p1440_p8, 1, 0 }
  0x16   : > { %p1056_p9 = pneg %p1440_p8  ;;  %s240_s14 = sshll.u32 %s1350_s13, 4  ;;  %s1455_s14 = int_to_ptr.vmem [resolvable:$true] %s240_s14 }
  0x17   : > { %s1351_s15 = smov [#allocation10]   ;;  %s1763_s2 = sld [smem:[#allocation18_spill]] }
  0x18   : > { %p1451_p11 = pnand %p1056_p9, %p1750_p1  ;;  %s1457_s16 = sshll.u32 %s1351_s15, 4  ;;  %s257_s16 = int_to_ptr.vmem [resolvable:$true] %s1457_s16 }
  0x1a   : > { %p1467_p13 = pneg %p1451_p11 }
  0x1d   : > { %s1125_s19 = scalar_lea.hbm %s1763_s2, 2048 }
  0x1e   : > { %p1126_p12 = scmp.ne.s32.totalorder %s1763_s2, %s1125_s19  ;;  %p1132_p5 = scmp.lt.u32.totalorder %s1125_s19, %s1763_s2 }
  0x20   : > { %p1128_p0 = pnand %p1467_p13, %p1126_p12 }
  0x22   : > { %p1129_p3 = pneg %p1128_p0 }
  0x24   : > { %p1134_p7 = pnand %p1132_p5, %p1129_p3 }
  0x26   : > { %1137 = shalt.err (!%p1134_p7)
}
  0x27   : > { %s1138_s10 = scalar_lea.vmem %s1444_s11, 2048  ;;  %p1146_p2 = scmp.lt.s32.totalorder %s1444_s11, %s1444_s11 }
  0x28   : > { %p1139_p9 = scmp.ne.s32.totalorder %s1444_s11, %s1138_s10  ;;  %p1147_p6 = scmp.lt.s32.totalorder %s1138_s10, %s1138_s10 }
  0x2a   : > { %p1141_p10 = pnand %p1139_p9, %p1467_p13  ;;  %p1148_p12 = por %p1147_p6, %p1146_p2 }
  0x2c   : > { %p1142_p1 = pneg %p1141_p10 }
  0x2e   : > { %p1149_p0 = pnand %p1148_p12, %p1142_p1 }
  0x30   : > { %1152 = shalt.err (!%p1149_p0)
}
  0x31   : > { %s1352_s13 = smov 128   ;;  %s1353_s15 = smov 8  }
  0x32   : > { %1059 = dma.hbm_to_vmem [thread:$0]  (!%p1451_p11), %s1763_s2, 2048, %s1444_s11, [#allocation6], %s1352_s13, %s1352_s13, %s1353_s15  }
  0x33   : > { %s1765_s3 = sld [smem:[#allocation19_spill]] }
  0x39   : > { %s1153_s21 = scalar_lea.hbm %s1765_s3, 2048 }
  0x3a   : > { %p1154_p1 = scmp.ne.s32.totalorder %s1765_s3, %s1153_s21  ;;  %p1160_p10 = scmp.lt.u32.totalorder %s1153_s21, %s1765_s3 }
  0x3c   : > { %p1156_p2 = pnand %p1154_p1, %p1467_p13 }
  0x3e   : > { %p1157_p6 = pneg %p1156_p2 }
  0x40   : > { %p1162_p3 = pnand %p1160_p10, %p1157_p6 }
  0x42   : > { %1165 = shalt.err (!%p1162_p3)
}
  0x43   : > { %s1166_s11 = scalar_lea.vmem %s1455_s14, 2048  ;;  %p1174_p12 = scmp.lt.s32.totalorder %s1455_s14, %s1455_s14 }
  0x44   : > { %p1167_p5 = scmp.ne.s32.totalorder %s1455_s14, %s1166_s11  ;;  %p1175_p0 = scmp.lt.s32.totalorder %s1166_s11, %s1166_s11 }
  0x46   : > { %p1169_p7 = pnand %p1167_p5, %p1467_p13  ;;  %p1176_p1 = por %p1175_p0, %p1174_p12 }
  0x48   : > { %p1170_p9 = pneg %p1169_p7 }
  0x4a   : > { %p1177_p2 = pnand %p1176_p1, %p1170_p9 }
  0x4c   : > { %1180 = shalt.err (!%p1177_p2)
}
  0x4d   : > { %1062 = dma.hbm_to_vmem [thread:$0]  (!%p1451_p11), %s1765_s3, 2048, %s1455_s14, [#allocation9], %s1352_s13, %s1352_s13, %s1353_s15  }
  0x4e   : > { %s1766_s5 = sld [smem:[#allocation20_spill]] }
  0x54   : > { %s1181_s20 = scalar_lea.hbm %s1766_s5, 2048 }
  0x55   : > { %p1182_p6 = scmp.ne.s32.totalorder %s1766_s5, %s1181_s20  ;;  %p1188_p5 = scmp.lt.u32.totalorder %s1181_s20, %s1766_s5 }
  0x57   : > { %p1184_p10 = pnand %p1182_p6, %p1467_p13 }
  0x59   : > { %p1185_p3 = pneg %p1184_p10 }
  0x5b   : > { %p1190_p7 = pnand %p1188_p5, %p1185_p3 }
  0x5d   : > { %1193 = shalt.err (!%p1190_p7)
}
  0x5e   : > { %s1194_s11 = scalar_lea.vmem %s257_s16, 2048  ;;  %p1202_p1 = scmp.lt.s32.totalorder %s257_s16, %s257_s16 }
  0x5f   : > { %p1195_p9 = scmp.ne.s32.totalorder %s257_s16, %s1194_s11  ;;  %p1203_p2 = scmp.lt.s32.totalorder %s1194_s11, %s1194_s11 }
  0x61   : > { %p1197_p12 = pnand %p1195_p9, %p1467_p13  ;;  %p1204_p4 = por %p1203_p2, %p1202_p1 }
  0x63   : > { %p1198_p0 = pneg %p1197_p12 }
  0x65   : > { %p1205_p8 = pnand %p1204_p4, %p1198_p0 }
  0x67   : > { %1208 = shalt.err (!%p1205_p8)
}
  0x68   : > { %1065 = dma.hbm_to_vmem [thread:$0]  (!%p1451_p11), %s1766_s5, 2048, %s257_s16, [#allocation9], %s1352_s13, %s1352_s13, %s1353_s15  }
  0x69   : > { %s1540_s22 = sadd.s32 1, %s1347_s27   ;;  %s34_s17 = sadd.s32 1, %s1343_s26 }
  0x6a   : > { %s31_s12 = ssub.s32 %s1347_s27, %s1540_s22  ;;  %p41_p8 = scmp.ne.s32.totalorder %s1343_s26, %s1339_s25 }
  0x6b   : > { %p32_p4 = scmp.eq.s32.totalorder %s31_s12, 0  ;;  %p42_p13 = scmp.eq.s32.totalorder %s1347_s27, 0 }
  0x6c   : > { %p1080_p6 = scmp.lt.s32.totalorder %s1347_s27, 2  ;;  %p1767_p3 = scmp.eq.s32.totalorder %s1421_s28, 1 }
  0x6d   : > { %s1550_s18 = scalar_select %p32_p4, %s1343_s26, %s34_s17  }
  0x6e   : > { %p43_p10 = por %p42_p13, %p41_p8  ;;  %p1554_p5 = por %p1767_p3, %p41_p8 }
  0x6f   : > { %s273_s20 = sand.u32 1, %s1343_s26   ;;  %s794_s21 = sshll.u32 %s1347_s27, 7 }
  0x70   : > { %s1768_s19 = scalar_select %p1554_p5, 1, 0 }
  0x71   : > { %s1560_s16 = sshll.u32 %s273_s20, 3  ;;  %s1565_s23 = scalar_lea.hbm %s1742_s0, %s794_s21 }
  0x72   : > { %s277_s29 = scalar_lea.vmem [#allocation2], %s1560_s16  ;;  %p1568_p11 = pnand %p1080_p6, %p43_p10 }
  0x73   : > { %s284_s10 = sshll.u32 %s277_s29, 4  ;;  %s1577_s12 = scalar_lea.hbm %s1743_s1, %s794_s21  ;;  %s1572_s10 = int_to_ptr.vmem [resolvable:$true] %s284_s10 }
  0x74   : > { %s274_s17 = scalar_lea.sflag [#allocation3], %s273_s20  ;;  %s1209_s13 = scalar_lea.hbm %s1565_s23, 128 }
  0x75   : > { %p1210_p7 = scmp.ne.s32.totalorder %s1565_s23, %s1209_s13  ;;  %p1211_p9 = pneg %p1568_p11 }
  0x76   : > { %s1214_s2 = scalar_lea.hbm %s1742_s0, 256  ;;  %p1215_p1 = scmp.lt.u32.totalorder %s1565_s23, %s1742_s0 }
  0x77   : > { %p1212_p12 = pnand %p1211_p9, %p1210_p7  ;;  %p1216_p2 = scmp.lt.u32.totalorder %s1214_s2, %s1209_s13 }
  0x78   : > { %p1218_p8 = scmp.lt.u32.totalorder %s1209_s13, %s1565_s23 }
  0x79   : > { %p1213_p0 = pneg %p1212_p12  ;;  %p1217_p4 = por %p1216_p2, %p1215_p1 }
  0x7b   : > { %p1219_p13 = por %p1218_p8, %p1217_p4 }
  0x7d   : > { %p1220_p6 = pnand %p1219_p13, %p1213_p0 }
  0x7f   : > { %1223 = shalt.err (!%p1220_p6)
}
  0x80   : > { %s1224_s20 = scalar_lea.vmem %s1572_s10, 128  ;;  %s1354_s21 = smov [#allocation2]  }
  0x81   : > { %p1225_p10 = scmp.ne.s32.totalorder %s1572_s10, %s1224_s20  ;;  %s1229_s14 = sshll.u32 %s1354_s21, 4  ;;  %s1230_s14 = int_to_ptr.vmem [resolvable:$false] %s1229_s14 }
  0x82   : > { %s1231_s3 = scalar_lea.vmem %s1230_s14, 256  ;;  %p1232_p12 = scmp.lt.s32.totalorder %s1572_s10, %s1230_s14 }
  0x83   : > { %p1227_p3 = pnand %p1225_p10, %p1211_p9  ;;  %p1233_p1 = scmp.lt.s32.totalorder %s1231_s3, %s1224_s20 }
  0x85   : > { %p1228_p7 = pneg %p1227_p3  ;;  %p1234_p2 = por %p1233_p1, %p1232_p12 }
  0x87   : > { %p1235_p4 = pnand %p1234_p2, %p1228_p7 }
  0x89   : > { %1238 = shalt.err (!%p1235_p4)
}
  0x8a   : > { %1069 = dma.hbm_to_vmem [thread:$0]  (!%p1568_p11), %s1565_s23, 128, %s1572_s10, %s274_s17  }
  0x8b   : > { %s291_s2 = sand.u32 1, %s1347_s27   ;;  %s295_s5 = scalar_lea.vmem [#allocation5], %s1560_s16 }
  0x8c   : > { %s302_s8 = sshll.u32 %s295_s5, 4  ;;  %s292_s13 = scalar_lea.sflag [#allocation6], %s291_s2  ;;  %s303_s8 = int_to_ptr.vmem [resolvable:$true] %s302_s8 }
  0x8d   : > { %s1239_s15 = scalar_lea.hbm %s1577_s12, 128  ;;  %s1244_s21 = scalar_lea.hbm %s1743_s1, 256 }
  0x8e   : > { %p1240_p0 = scmp.ne.s32.totalorder %s1577_s12, %s1239_s15  ;;  %p1245_p6 = scmp.lt.u32.totalorder %s1577_s12, %s1743_s1 }
  0x8f   : > { %p1246_p10 = scmp.lt.u32.totalorder %s1244_s21, %s1239_s15  ;;  %p1248_p7 = scmp.lt.u32.totalorder %s1239_s15, %s1577_s12 }
  0x90   : > { %p1242_p8 = pnand %p1240_p0, %p1211_p9 }
  0x91   : > { %p1247_p3 = por %p1246_p10, %p1245_p6 }
  0x92   : > { %p1243_p13 = pneg %p1242_p8 }
  0x93   : > { %p1249_p12 = por %p1248_p7, %p1247_p3 }
  0x95   : > { %p1250_p1 = pnand %p1249_p12, %p1243_p13 }
  0x97   : > { %1253 = shalt.err (!%p1250_p1)
}
  0x98   : > { %s1254_s16 = scalar_lea.vmem %s303_s8, 128  ;;  %s1355_s23 = smov [#allocation5]  }
  0x99   : > { %p1255_p2 = scmp.ne.s32.totalorder %s303_s8, %s1254_s16  ;;  %s1259_s10 = sshll.u32 %s1355_s23, 4  ;;  %s1260_s10 = int_to_ptr.vmem [resolvable:$false] %s1259_s10 }
  0x9a   : > { %s1261_s17 = scalar_lea.vmem %s1260_s10, 256  ;;  %p1262_p8 = scmp.lt.s32.totalorder %s303_s8, %s1260_s10 }
  0x9b   : > { %p1257_p4 = pnand %p1255_p2, %p1211_p9  ;;  %p1263_p5 = scmp.lt.s32.totalorder %s1261_s17, %s1254_s16 }
  0x9d   : > { %p1258_p0 = pneg %p1257_p4  ;;  %p1264_p6 = por %p1263_p5, %p1262_p8 }
  0x9f   : > { %p1265_p10 = pnand %p1264_p6, %p1258_p0 }
  0xa1   : > { %1268 = shalt.err (!%p1265_p10)
}
  0xa2   : > { %1072 = dma.hbm_to_vmem [thread:$0]  (!%p1568_p11), %s1577_s12, 128, %s303_s8, %s292_s13  }
  0xa3   : > { %p1770_p13 = scmp.ne.s32.totalorder %s1761_s9, 0 }
  0xa4   : > { %s1628_s2 = sand.u32 (!%p1770_p13), 1, %s1339_s25   ;;  %p1771_p5 = scmp.ne.s32.totalorder (!%p1770_p13), %s1758_s30, 0 }
  0xa5   : > { %311 = sbr.rel (%p1770_p13) target bundleno = 666 (0x29a), region = 48  ;;  %s1631_s5 = sshll.u32 (!%p1770_p13), %s1628_s2, 3 }
  0xa6   : > { %s314_s15 = scalar_lea.sflag (!%p1770_p13), [#allocation3], %s1628_s2  ;;  %s317_s29 = scalar_lea.vmem (!%p1770_p13), [#allocation2], %s1631_s5 }
  0xac   : > { %1314 = dma.done.wait (%p1771_p5), %s314_s15, 128  }
  0xad   : > { %1316 = vsyncadd (%p1771_p5), %s314_s15, 4294967168  ;;  %s322_s9 = sand.u32 1, %s1421_s28   ;;  %s326_s12 = scalar_lea.vmem [#allocation5], %s1631_s5 }
  0xae   : > { %s323_s11 = scalar_lea.sflag [#allocation6], %s322_s9 }
  0xaf   : > { %1318 = dma.done.wait (%p1771_p5), %s323_s11, 128  }
  0xb0   : > { %1320 = vsyncadd (%p1771_p5), %s323_s11, 4294967168  ;;  %p1772_p11 = scmp.eq.s32.totalorder %s1421_s28, 0 }
  0xb2   : > { %1322 = dma.done.wait (%p1772_p11), [#allocation6], 2048   ;;  %p1773_p9 = pmov %p1772_p11 }
  0xb4   : > { %1324 = vsyncadd (%p1773_p9), [#allocation6], 4294965248  ;;  %p1774_p3 = pmov %p1773_p9 }
  0xb6   : > { %1326 = dma.done.wait (%p1774_p3), [#allocation9], 4096   ;;  %p1775_p7 = pmov %p1774_p3 }
  0xb7   : > { %v1356_v0 = vmov 0.0|0.0   ;;  %vm1357_vm0 = vmmov 0   ;;  %v1358_v1 = vmov 0.0   ;;  %v392_v2 = vld [vmem:[#allocation8] sm:$0xff]  ;;  %v393_v3 = vld [vmem:[#allocation8 + $0x8] sm:$0xff]  ;;  %v394_v7 = vld [vmem:[#allocation8 + $0x10] sm:$0xff] }
  0xb8   : > { %1328 = vsyncadd (%p1775_p7), [#allocation9], 4294963200  ;;  %966 = vmatprep.subr.bf16.mxu0 %v1356_v0  ;;  %990 = vmatprep.subr.bf16.mxu1 %v1356_v0  ;;  %v375_v4 = vld [vmem:[#allocation7] sm:$0xff]  ;;  %v967_v5 = vpack.c.bf16 %v393_v3, %v392_v2  ;;  %v376_v6 = vld [vmem:[#allocation7 + $0x8] sm:$0xff]  ;;  %s807_s21 = sshll.u32 %s1421_s28, 7  ;;  %s373_s14 = scalar_lea.vmem [#allocation11], %s1631_s5 }
  0xb9   : > { %893 = vmatprep.mubr.msk.f32.mxu0 %vm1357_vm0, %v1358_v1  ;;  %928 = vmatprep.mubr.msk.f32.mxu1 %vm1357_vm0, %v1358_v1  ;;  %v395_v8 = vld [vmem:[#allocation8 + $0x18] sm:$0xff]  ;;  %v991_v9 = vpack.c.bf16 %v376_v6, %v375_v4  ;;  %v377_v10 = vld [vmem:[#allocation7 + $0x10] sm:$0xff]  ;;  %v396_v14 = vld [vmem:[#allocation8 + $0x20] sm:$0xff]  ;;  %s666_s3 = sshll.u32 %s373_s14, 4  ;;  %s1698_s10 = scalar_lea.hbm %s1749_s7, %s807_s21  ;;  %s1700_s3 = int_to_ptr.vmem [resolvable:$true] %s666_s3 }
  0xba   : > { %v378_v11 = vld [vmem:[#allocation7 + $0x18] sm:$0xff]  ;;  %968 = vmatpush3.bf16.msra.mxu0 %v967_v5  ;;  %v970_v12 = vpack.c.bf16 %v395_v8, %v394_v7  ;;  %v397_v15 = vld [vmem:[#allocation8 + $0x28] sm:$0xff]  ;;  %v379_v16 = vld [vmem:[#allocation7 + $0x20] sm:$0xff]  ;;  %s653_s17 = scalar_lea.sflag [#allocation4], %s1628_s2  ;;  %s1269_s15 = scalar_lea.vmem %s1700_s3, 128 }
  0xbb   : > { %992 = vmatpush3.bf16.msra.mxu1 %v991_v9  ;;  %969 = vmatprep.subr.bf16.mxu0 %v1356_v0  ;;  %v994_v13 = vpack.c.bf16 %v378_v11, %v377_v10  ;;  %v380_v17 = vld [vmem:[#allocation7 + $0x28] sm:$0xff]  ;;  %v973_v18 = vpack.c.bf16 %v397_v15, %v396_v14  ;;  %v398_v20 = vld [vmem:[#allocation8 + $0x30] sm:$0xff]  ;;  %v399_v21 = vld [vmem:[#allocation8 + $0x38] sm:$0xff]  ;;  %p1270_p12 = scmp.ne.s32.totalorder %s1700_s3, %s1269_s15  ;;  %p1776_p1 = scmp.ne.s32.totalorder %s1768_s19, 0 }
  0xbc   : > { %993 = vmatprep.subr.bf16.mxu1 %v1356_v0  ;;  %v997_v19 = vpack.c.bf16 %v380_v17, %v379_v16  ;;  %v381_v22 = vld [vmem:[#allocation7 + $0x30] sm:$0xff]  ;;  %v382_v23 = vld [vmem:[#allocation7 + $0x38] sm:$0xff]  ;;  %v976_v24 = vpack.c.bf16 %v399_v21, %v398_v20  ;;  %v400_v26 = vld [vmem:[#allocation8 + $0x40] sm:$0xff]  ;;  %s1359_s28 = smov [#allocation11]  }
  0xbd   : > { %v1000_v25 = vpack.c.bf16 %v382_v23, %v381_v22  ;;  %v401_v27 = vld [vmem:[#allocation8 + $0x48] sm:$0xff]  ;;  %v383_v28 = vld [vmem:[#allocation7 + $0x40] sm:$0xff]  ;;  %v402_v32 = vld [vmem:[#allocation8 + $0x50] sm:$0xff]  ;;  %p1271_p2 = pnand %p1270_p12, %p1776_p1  ;;  %s1273_s5 = sshll.u32 %s1359_s28, 4  ;;  %s1274_s5 = int_to_ptr.vmem [resolvable:$false] %s1273_s5 }
  0xbe   : > { %971 = vmatpush3.bf16.msra.mxu0 %v970_v12  ;;  %v384_v29 = vld [vmem:[#allocation7 + $0x48] sm:$0xff]  ;;  %v979_v30 = vpack.c.bf16 %v401_v27, %v400_v26  ;;  %v403_v33 = vld [vmem:[#allocation8 + $0x58] sm:$0xff]  ;;  %v385_v34 = vld [vmem:[#allocation7 + $0x50] sm:$0xff]  ;;  %p1276_p0 = scmp.lt.s32.totalorder %s1700_s3, %s1274_s5 }
  0xbf   : > { %995 = vmatpush3.bf16.msra.mxu1 %v994_v13  ;;  %972 = vmatprep.subr.bf16.mxu0 %v1356_v0  ;;  %v1003_v31 = vpack.c.bf16 %v384_v29, %v383_v28  ;;  %v386_v35 = vld [vmem:[#allocation7 + $0x58] sm:$0xff]  ;;  %v982_v36 = vpack.c.bf16 %v403_v33, %v402_v32  ;;  %v404_v38 = vld [vmem:[#allocation8 + $0x60] sm:$0xff]  ;;  %v405_v39 = vld [vmem:[#allocation8 + $0x68] sm:$0xff]  ;;  %p1272_p4 = pneg %p1271_p2 }
  0xc0   : > { %996 = vmatprep.subr.bf16.mxu1 %v1356_v0  ;;  %v1006_v37 = vpack.c.bf16 %v386_v35, %v385_v34  ;;  %v387_v40 = vld [vmem:[#allocation7 + $0x60] sm:$0xff]  ;;  %v388_v41 = vld [vmem:[#allocation7 + $0x68] sm:$0xff]  ;;  %v985_v42 = vpack.c.bf16 %v405_v39, %v404_v38  ;;  %v406_v44 = vld [vmem:[#allocation8 + $0x70] sm:$0xff] }
  0xc1   : > { %v1009_v43 = vpack.c.bf16 %v388_v41, %v387_v40  ;;  %v407_v45 = vld [vmem:[#allocation8 + $0x78] sm:$0xff]  ;;  %v389_v46 = vld [vmem:[#allocation7 + $0x70] sm:$0xff]  ;;  %v557_v50 = vld [vmem:[#allocation10] sm:$0xff] }
  0xc2   : > { %974 = vmatpush3.bf16.msra.mxu0 %v973_v18  ;;  %v390_v47 = vld [vmem:[#allocation7 + $0x78] sm:$0xff]  ;;  %v988_v48 = vpack.c.bf16 %v407_v45, %v406_v44  ;;  %v558_v51 = vld [vmem:[#allocation10 + $0x8] sm:$0xff]  ;;  %v559_v55 = vld [vmem:[#allocation10 + $0x10] sm:$0xff] }
  0xc3   : > { %998 = vmatpush3.bf16.msra.mxu1 %v997_v19  ;;  %975 = vmatprep.subr.bf16.mxu0 %v1356_v0  ;;  %v1012_v49 = vpack.c.bf16 %v390_v47, %v389_v46  ;;  %v391_v52 = vld [vmem:[%s326_s12] sm:$0xff]  ;;  %v1015_v53 = vpack.c.bf16 %v558_v51, %v557_v50  ;;  %v374_v54 = vld [vmem:[%s317_s29] sm:$0xff]  ;;  %s1275_s29 = scalar_lea.vmem %s1274_s5, 256 }
  0xc4   : > { %999 = vmatprep.subr.bf16.mxu1 %v1356_v0  ;;  %v560_v56 = vld [vmem:[#allocation10 + $0x18] sm:$0xff]  ;;  %v561_v58 = vld [vmem:[#allocation10 + $0x20] sm:$0xff]  ;;  %v562_v59 = vld [vmem:[#allocation10 + $0x28] sm:$0xff]  ;;  %p1277_p8 = scmp.lt.s32.totalorder %s1275_s29, %s1269_s15 }
  0xc5   : > { %v1018_v57 = vpack.c.bf16 %v560_v56, %v559_v55  ;;  %v1021_v60 = vpack.c.bf16 %v562_v59, %v561_v58  ;;  %v563_v61 = vld [vmem:[#allocation10 + $0x30] sm:$0xff]  ;;  %v564_v62 = vld [vmem:[#allocation10 + $0x38] sm:$0xff]  ;;  %v565_v2 = vld [vmem:[#allocation10 + $0x40] sm:$0xff] }
  0xc6   : > { %977 = vmatpush3.bf16.msra.mxu0 %v976_v24  ;;  %v1024_v63 = vpack.c.bf16 %v564_v62, %v563_v61  ;;  %v566_v3 = vld [vmem:[#allocation10 + $0x48] sm:$0xff]  ;;  %v567_v5 = vld [vmem:[#allocation10 + $0x50] sm:$0xff]  ;;  %v568_v6 = vld [vmem:[#allocation10 + $0x58] sm:$0xff]  ;;  %p1278_p6 = por %p1277_p8, %p1276_p0 }
  0xc7   : > { %1001 = vmatpush3.bf16.msra.mxu1 %v1000_v25  ;;  %978 = vmatprep.subr.bf16.mxu0 %v1356_v0  ;;  %v1027_v4 = vpack.c.bf16 %v566_v3, %v565_v2  ;;  %v569_v7 = vld [vmem:[#allocation10 + $0x60] sm:$0xff]  ;;  %v570_v8 = vld [vmem:[#allocation10 + $0x68] sm:$0xff]  ;;  %v571_v10 = vld [vmem:[#allocation10 + $0x70] sm:$0xff] }
  0xc8   : > { %1002 = vmatprep.subr.bf16.mxu1 %v1356_v0  ;;  %v1033_v9 = vpack.c.bf16 %v570_v8, %v569_v7  ;;  %v572_v11 = vld [vmem:[#allocation10 + $0x78] sm:$0xff]  ;;  %v804_v15 = vld [vmem:[%s1746_s4] ss:$0 sm:$0xff]  ;;  %p1279_p10 = pnand %p1278_p6, %p1272_p4 }
  0xc9   : > { %v1036_v12 = vpack.c.bf16 %v572_v11, %v571_v10 }
  0xca   : > { %980 = vmatpush3.bf16.msra.mxu0 %v979_v30 }
  0xcb   : > { %1004 = vmatpush3.bf16.msra.mxu1 %v1003_v31  ;;  %981 = vmatprep.subr.bf16.mxu0 %v1356_v0 }
  0xcc   : > { %1005 = vmatprep.subr.bf16.mxu1 %v1356_v0 }
  0xce   : > { %983 = vmatpush3.bf16.msra.mxu0 %v982_v36 }
  0xcf   : > { %1007 = vmatpush3.bf16.msra.mxu1 %v1006_v37  ;;  %984 = vmatprep.subr.bf16.mxu0 %v1356_v0 }
  0xd0   : > { %1008 = vmatprep.subr.bf16.mxu1 %v1356_v0 }
  0xd2   : > { %986 = vmatpush3.bf16.msra.mxu0 %v985_v42 }
  0xd3   : > { %1010 = vmatpush3.bf16.msra.mxu1 %v1009_v43  ;;  %987 = vmatprep.subr.bf16.mxu0 %v1356_v0 }
  0xd4   : > { %1011 = vmatprep.subr.bf16.mxu1 %v1356_v0 }
  0xd6   : > { %989 = vmatpush3.bf16.msra.mxu0 %v988_v48 }
  0xd7   : > { %1013 = vmatpush3.bf16.msra.mxu1 %v1012_v49  ;;  %1014 = vmatprep.subr.bf16.mxu0 %v1356_v0 }
  0xd9   : > { %894 = vmatmul.mubr.f32.vlgmr.msra.gmra.mrb[0].mxu0 %v391_v52 }
  0xda   : > { %929 = vmatmul.mubr.f32.vlgmr.msra.gmra.mrb[0].mxu1 %v374_v54  ;;  %1016 = vmatpush3.bf16.msra.mxu0 %v1015_v53 }
  0xdb   : > { %1017 = vmatprep.subr.bf16.mxu0 %v1356_v0  ;;  %963 = vmatprep.mubr.msk.f32.mxu0 %vm1357_vm0, %v1358_v1  ;;  %v1030_v1 = vpack.c.bf16 %v568_v6, %v567_v5 }
  0xde   : > { %1019 = vmatpush3.bf16.msra.mxu0 %v1018_v57 }
  0xdf   : > { %1020 = vmatprep.subr.bf16.mxu0 %v1356_v0 }
  0xe2   : > { %1022 = vmatpush3.bf16.msra.mxu0 %v1021_v60 }
  0xe3   : > { %1023 = vmatprep.subr.bf16.mxu0 %v1356_v0 }
  0xe6   : > { %1025 = vmatpush3.bf16.msra.mxu0 %v1024_v63 }
  0xe7   : > { %1026 = vmatprep.subr.bf16.mxu0 %v1356_v0 }
  0xea   : > { %1028 = vmatpush3.bf16.msra.mxu0 %v1027_v4 }
  0xeb   : > { %1029 = vmatprep.subr.bf16.mxu0 %v1356_v0 }
  0xee   : > { %1031 = vmatpush3.bf16.msra.mxu0 %v1030_v1 }
  0xef   : > { %1032 = vmatprep.subr.bf16.mxu0 %v1356_v0 }
  0xf2   : > { %1034 = vmatpush3.bf16.msra.mxu0 %v1033_v9 }
  0xf3   : > { %1035 = vmatprep.subr.bf16.mxu0 %v1356_v0  ;;  %v805_v0 = vld [vmem:[%s1748_s6] ss:$0 sm:$0xff] }
  0xf6   : > { %1037 = vmatpush3.bf16.msra.mxu0 %v1036_v12 }
 0x1ac   : > { %v474_v13 = vpop.f32.mrb[0].mxu0 }
 0x1ad   : > { %v544_v14 = vpop.f32.mrb[0].mxu1  ;;  %v895_v16 = vpop.f32.mrb[1].mxu0 }
 0x1ae   : > { %v545_v17 = vadd.f32 %v544_v14, %v474_v13  ;;  %v930_v18 = vpop.f32.mrb[1].mxu1 }
 0x1b0   : > { %v555_v19 = vadd.f32 %v804_v15, %v545_v17 }
 0x1b2   : > { %v556_v20 = vmax.f32 %v555_v19, 0.0 }
 0x1b4   : > { %964 = vmatmul.mubr.f32.vlgmr.msra.gmra.mrb[2].mxu0 %v556_v20 }
 0x287   : > { %v646_v21 = vpop.f32.mrb[2].mxu0 }
 0x288   : > { %v647_v22 = vadd.f32 %v805_v0, %v646_v21  ;;  %v965_v23 = vpop.f32.mrb[3].mxu0 }
 0x28a   : > { %v650_v24 = vmax.f32 %v647_v22, 0.0 }
 0x28c   : > { %651 = vst [vmem:[%s373_s14] sm:$0xff] %v650_v24 }
 0x28d   : > { %1282 = shalt.err (!%p1279_p10)
}
 0x28e   : > { %s1283_s2 = scalar_lea.hbm %s1698_s10, 128  ;;  %s1287_s12 = scalar_lea.hbm %s1749_s7, 256 }
 0x28f   : > { %p1284_p13 = scmp.ne.s32.totalorder %s1698_s10, %s1283_s2  ;;  %p1288_p9 = scmp.lt.u32.totalorder %s1698_s10, %s1749_s7 }
 0x290   : > { %p1289_p3 = scmp.lt.u32.totalorder %s1287_s12, %s1283_s2  ;;  %p1291_p12 = scmp.lt.u32.totalorder %s1283_s2, %s1698_s10 }
 0x291   : > { %p1285_p5 = pnand %p1284_p13, %p1776_p1 }
 0x292   : > { %p1290_p7 = por %p1289_p3, %p1288_p9 }
 0x293   : > { %p1286_p11 = pneg %p1285_p5 }
 0x294   : > { %p1292_p2 = por %p1291_p12, %p1290_p7 }
 0x296   : > { %p1293_p4 = pnand %p1292_p2, %p1286_p11 }
 0x298   : > { %1296 = shalt.err (!%p1293_p4)
}
 0x299   : > { %1054 = dma.vmem_to_hbm [thread:$0]  (%p1776_p1), %s1700_s3, 128, %s1698_s10, %s653_s17  }
 0x29a PF: > { %s1777_s13 = sld [smem:[#allocation17_spill]]  ;;  %s678_s20 = sand.u32 1, %s1335_s24  }
 0x29b   : > { %p1779_p8 = scmp.ge.s32.totalorder %s1347_s27, 2  ;;  %s679_s21 = scalar_lea.sflag [#allocation4], %s678_s20 }
 0x2a0   : > { %p1778_p0 = scmp.ne.s32.totalorder %s1777_s13, 0 }
 0x2a2   : > { %p1074_p6 = pnand %p1779_p8, %p1778_p0 }
 0x2a4   : > { %1330 = dma.done.wait (!%p1074_p6), %s679_s21, 128  }
 0x2a5   : > { %1332 = vsyncadd (!%p1074_p6), %s679_s21, 4294967168  ;;  %p24_p10 = scmp.ge.s32.totalorder %s1540_s22, 4   ;;  %s1780_s24 = smov %s1339_s25 }
 0x2a6   : > { %s1781_s25 = smov %s1343_s26  ;;  %s1782_s26 = smov %s1550_s18 }
 0x2a7   : > { %s1783_s27 = smov %s1540_s22  ;;  %26 = sbr.rel (!%p24_p10) target bundleno = 12 (0xc), region = 118 }
 0x2ae   :  { %684 = vsyncpa [#allocation3], 1 }
 0x2af   :  { %686 = vsyncpa [#allocation3 + $0x1], 1 }
 0x2b0   :  { %687 = vsyncpa [#allocation6], 1 }
 0x2b1   :  { %689 = vsyncpa [#allocation6 + $0x1], 1 }
 0x2b2   :  { %690 = vsyncpa [#allocation9], 1 }
 0x2b3   :  { %691 = vsyncpa [#allocation4], 1 }
 0x2b4   :  { %693 = vsyncpa [#allocation4 + $0x1], 1 }

</bundles_post_ra>
